<compile_context>
chip_gen: v7x
topology: tpu7x:2x2x1
jax: 0.10.0
libtpu: 0.0.40
codegen_flags: <defaults>
</compile_context>

<pallas_src>
import functools

import jax
import jax.numpy as jnp
import numpy as np
from jax.experimental import pallas as pl
from jax.experimental.pallas import tpu as pltpu


def _glu_kernel(x_ref, wa_ref, wb_ref, ga_ref, gb_ref, ba_ref, bb_ref, o_ref,
                *, chunks_per_step, vbs, eps):
    # x_ref : (rows, in_dim) with rows = chunks_per_step * vbs
    # wa/wb : (in_dim, out_dim)  lane-aligned halves of the linear weight
    # ga/gb, ba/bb : (1, out_dim) BN gamma/beta halves
    # o_ref : (rows, out_dim)
    rows = chunks_per_step * vbs
    out_dim = wa_ref.shape[-1]

    x = x_ref[...]                                                   # (rows, in_dim)

    # One big MXU matmul per GLU half (no in-vreg split at column out_dim).
    ya = jnp.dot(x, wa_ref[...], preferred_element_type=jnp.float32)  # (rows, out_dim)
    yb = jnp.dot(x, wb_ref[...], preferred_element_type=jnp.float32)  # (rows, out_dim)

    def ghost_bn(y, gamma, beta):
        # Per-chunk (ghost batch) statistics, vectorized over chunks_per_step.
        y3 = y.reshape(chunks_per_step, vbs, out_dim)
        mean = jnp.mean(y3, axis=1, keepdims=True)                     # (cps,1,out_dim)
        var = jnp.mean(y3 * y3, axis=1, keepdims=True) - mean * mean   # one-pass var
        scale = gamma * jax.lax.rsqrt(var + eps)                       # fold gamma
        return (y3 - mean) * scale + beta                              # (cps,vbs,out_dim)

    a = ghost_bn(ya, ga_ref[...], ba_ref[...])
    b = ghost_bn(yb, gb_ref[...], bb_ref[...])

    out = a * jax.nn.sigmoid(b)
    o_ref[...] = out.reshape(rows, out_dim).astype(o_ref.dtype)


def _choose_chunks_per_step(n_chunks, vbs, target_rows=256):
    """Largest divisor of n_chunks whose row count fits the target and keeps the
    block's second-to-last dim a multiple of 8 sublanes (or spans the full batch)."""
    candidates = []
    for cps in range(1, n_chunks + 1):
        if n_chunks % cps:
            continue
        rows = cps * vbs
        if rows % 8 != 0 and cps != n_chunks:
            continue
        candidates.append(cps)
    fitting = [c for c in candidates if c * vbs <= target_rows]
    return max(fitting) if fitting else min(candidates)


def glu_layer_forward(x, w, gamma, beta, *, output_dim, virtual_batch_size,
                      eps=1e-5, target_rows_per_step=256):
    """x: (B, in_dim) f32; w: (in_dim, 2*out_dim) (= torch weight transposed);
    gamma/beta: (1, 2*out_dim)."""
    batch, in_dim = x.shape
    two_out = 2 * output_dim
    assert w.shape == (in_dim, two_out)
    assert gamma.shape == (1, two_out) and beta.shape == (1, two_out)
    # TODO(synk): torch GBN ceil-splits and allows a ragged final chunk; this
    # kernel requires batch % virtual_batch_size == 0.
    assert batch % virtual_batch_size == 0, "batch must be a multiple of vbs"
    n_chunks = batch // virtual_batch_size

    cps = _choose_chunks_per_step(n_chunks, virtual_batch_size, target_rows_per_step)
    rows = cps * virtual_batch_size
    n_steps = n_chunks // cps

    # Structural GLU split: lane-aligned halves of weight / BN params.
    w_a, w_b = w[:, :output_dim], w[:, output_dim:]
    g_a, g_b = gamma[:, :output_dim], gamma[:, output_dim:]
    b_a, b_b = beta[:, :output_dim], beta[:, output_dim:]

    kernel = functools.partial(
        _glu_kernel, chunks_per_step=cps, vbs=virtual_batch_size, eps=eps)

    itemsize = x.dtype.itemsize
    flops = 2 * batch * in_dim * two_out
    transcendentals = batch * output_dim + 2 * n_chunks * output_dim  # sigmoid + rsqrt
    bytes_accessed = (batch * in_dim + in_dim * two_out + 2 * two_out
                      + batch * output_dim) * itemsize

    # Double-buffered x/out blocks + resident weights/params, with headroom.
    needed_vmem = (2 * rows * (in_dim + output_dim)
                   + in_dim * two_out + 2 * two_out) * itemsize
    vmem_limit = int(min(64 * 2 ** 20, max(32 * 2 ** 20, 8 * needed_vmem)))

    out = pl.pallas_call(
        kernel,
        out_shape=jax.ShapeDtypeStruct((batch, output_dim), x.dtype),
        grid_spec=pltpu.PrefetchScalarGridSpec(
            num_scalar_prefetch=0,
            grid=(n_steps,),
            in_specs=[
                pl.BlockSpec((rows, in_dim), lambda s: (s, 0)),          # x
                pl.BlockSpec((in_dim, output_dim), lambda s: (0, 0)),    # w_a
                pl.BlockSpec((in_dim, output_dim), lambda s: (0, 0)),    # w_b
                pl.BlockSpec((1, output_dim), lambda s: (0, 0)),         # gamma_a
                pl.BlockSpec((1, output_dim), lambda s: (0, 0)),         # gamma_b
                pl.BlockSpec((1, output_dim), lambda s: (0, 0)),         # beta_a
                pl.BlockSpec((1, output_dim), lambda s: (0, 0)),         # beta_b
            ],
            out_specs=pl.BlockSpec((rows, output_dim), lambda s: (s, 0)),
        ),
        compiler_params=pltpu.CompilerParams(
            dimension_semantics=("parallel",),
            vmem_limit_bytes=vmem_limit,
        ),
        cost_estimate=pl.CostEstimate(
            flops=flops, transcendentals=transcendentals,
            bytes_accessed=bytes_accessed),
    )(x, w_a, w_b, g_a, g_b, b_a, b_b)

    return out


def _reference(x, w, gamma, beta, output_dim, vbs, eps=1e-5):
    y = x @ w
    n_chunks = x.shape[0] // vbs
    outs = []
    for c in range(n_chunks):
        yc = y[c * vbs:(c + 1) * vbs]
        mean = yc.mean(axis=0, keepdims=True)
        var = ((yc - mean) ** 2).mean(axis=0, keepdims=True)
        yn = (yc - mean) / jnp.sqrt(var + eps) * gamma + beta
        outs.append(yn[:, :output_dim] * jax.nn.sigmoid(yn[:, output_dim:]))
    return jnp.concatenate(outs, axis=0)


def _make_params(key, input_dim, output_dim):
    # Deterministic xavier_normal_ with TabNet's gain (initialize_glu):
    #   gain = sqrt((input_dim + 2*output_dim) / sqrt(input_dim))
    #   std  = gain * sqrt(2 / (fan_in + fan_out))
    two_out = 2 * output_dim
    gain = np.sqrt((input_dim + two_out) / np.sqrt(input_dim))
    std = gain * np.sqrt(2.0 / (input_dim + two_out))
    # torch Linear weight is (2*out_dim, in_dim); store its transpose for x @ W.
    w = jax.random.normal(key, (input_dim, two_out), dtype=jnp.float32) * std
    gamma = jnp.ones((1, two_out), dtype=jnp.float32)   # BatchNorm1d init
    beta = jnp.zeros((1, two_out), dtype=jnp.float32)
    return w, gamma, beta


if __name__ == "__main__":
    key = jax.random.PRNGKey(0)
    kx1, kx2, kw = jax.random.split(key, 3)

    input_dim, output_dim = 32, 16
    w, gamma, beta = _make_params(kw, input_dim, output_dim)

    # Test 1: tiny shapes (same as original demo): 2 ghost chunks packed into 1 step.
    x1 = jax.random.normal(kx1, (8, input_dim), dtype=jnp.float32)
    out1 = glu_layer_forward(x1, w, gamma, beta,
                             output_dim=output_dim, virtual_batch_size=4)
    out1 = jax.block_until_ready(out1)
    ref1 = _reference(x1, w, gamma, beta, output_dim, 4)
    np.testing.assert_allclose(np.asarray(out1), np.asarray(ref1),
                               rtol=1e-4, atol=1e-5)

    # Test 2: TabNet-default vbs=128; 4 chunks -> 2 per step, 2 grid steps
    # (exercises the multi-step / megacore-parallel path with 256-row tiles).
    x2 = jax.random.normal(kx2, (512, input_dim), dtype=jnp.float32)
    out2 = glu_layer_forward(x2, w, gamma, beta,
                             output_dim=output_dim, virtual_batch_size=128)
    out2 = jax.block_until_ready(out2)
    ref2 = _reference(x2, w, gamma, beta, output_dim, 128)
    np.testing.assert_allclose(np.asarray(out2), np.asarray(ref2),
                               rtol=1e-4, atol=1e-5)

    print("KERNEL_OK")
</pallas_src>

<mosaic_0001>
module attributes {stable_mosaic.version = 11 : i64} {
  func.func @_glu_kernel(%arg0: i32, %arg1: memref<8x32xf32, #tpu.memory_space<vmem>>, %arg2: memref<32x16xf32, #tpu.memory_space<vmem>>, %arg3: memref<32x16xf32, #tpu.memory_space<vmem>>, %arg4: memref<1x16xf32, #tpu.memory_space<vmem>>, %arg5: memref<1x16xf32, #tpu.memory_space<vmem>>, %arg6: memref<1x16xf32, #tpu.memory_space<vmem>>, %arg7: memref<1x16xf32, #tpu.memory_space<vmem>>, %arg8: memref<8x16xf32, #tpu.memory_space<vmem>>) attributes {dimension_semantics = [#tpu.dimension_semantics<parallel>], iteration_bounds = array<i64: 1>, scalar_prefetch = 0 : i64, scratch_operands = 0 : i64, tpu.core_type = #tpu.core_type<tc>, window_params = [{transform_indices = @transform_0, window_bounds = array<i64: 8, 32>}, {pipeline_mode = #tpu.pipeline_mode<synchronous>, transform_indices = @transform_1, window_bounds = array<i64: 32, 16>}, {pipeline_mode = #tpu.pipeline_mode<synchronous>, transform_indices = @transform_2, window_bounds = array<i64: 32, 16>}, {pipeline_mode = #tpu.pipeline_mode<synchronous>, transform_indices = @transform_3, window_bounds = array<i64: 1, 16>}, {pipeline_mode = #tpu.pipeline_mode<synchronous>, transform_indices = @transform_4, window_bounds = array<i64: 1, 16>}, {pipeline_mode = #tpu.pipeline_mode<synchronous>, transform_indices = @transform_5, window_bounds = array<i64: 1, 16>}, {pipeline_mode = #tpu.pipeline_mode<synchronous>, transform_indices = @transform_6, window_bounds = array<i64: 1, 16>}, {transform_indices = @transform_7, window_bounds = array<i64: 8, 16>}]} {
    %c0 = arith.constant 0 : index
    %c0_0 = arith.constant 0 : index
    %0 = vector.load %arg1[%c0, %c0_0] : memref<8x32xf32, #tpu.memory_space<vmem>>, vector<8x32xf32>
    %c0_1 = arith.constant 0 : index
    %c0_2 = arith.constant 0 : index
    %1 = vector.load %arg2[%c0_1, %c0_2] : memref<32x16xf32, #tpu.memory_space<vmem>>, vector<32x16xf32>
    %cst = arith.constant dense<0.000000e+00> : vector<8x16xf32>
    %2 = tpu.matmul %0, %1, %cst {dimension_numbers = #tpu.dot_dimension_numbers<[1], [0], [0], [1], [0, 0, 1, 1], [], []>} : vector<8x32xf32>, vector<32x16xf32>, vector<8x16xf32> -> vector<8x16xf32>
    %c0_3 = arith.constant 0 : index
    %c0_4 = arith.constant 0 : index
    %3 = vector.load %arg3[%c0_3, %c0_4] : memref<32x16xf32, #tpu.memory_space<vmem>>, vector<32x16xf32>
    %cst_5 = arith.constant dense<0.000000e+00> : vector<8x16xf32>
    %4 = tpu.matmul %0, %3, %cst_5 {dimension_numbers = #tpu.dot_dimension_numbers<[1], [0], [0], [1], [0, 0, 1, 1], [], []>} : vector<8x32xf32>, vector<32x16xf32>, vector<8x16xf32> -> vector<8x16xf32>
    %c0_6 = arith.constant 0 : index
    %c0_7 = arith.constant 0 : index
    %5 = vector.load %arg4[%c0_6, %c0_7] : memref<1x16xf32, #tpu.memory_space<vmem>>, vector<1x16xf32>
    %c0_8 = arith.constant 0 : index
    %c0_9 = arith.constant 0 : index
    %6 = vector.load %arg6[%c0_8, %c0_9] : memref<1x16xf32, #tpu.memory_space<vmem>>, vector<1x16xf32>
    %7 = vector.shape_cast %2 : vector<8x16xf32> to vector<2x4x16xf32>
    %cst_10 = arith.constant dense<0.000000e+00> : vector<2x16xf32>
    %8 = vector.multi_reduction <add>, %7, %cst_10 [1] : vector<2x4x16xf32> to vector<2x16xf32>
    %9 = vector.shape_cast %8 : vector<2x16xf32> to vector<2x1x16xf32>
    %cst_11 = arith.constant 4.000000e+00 : f32
    %10 = vector.broadcast %cst_11 : f32 to vector<2x1x16xf32>
    %11 = arith.divf %9, %10 : vector<2x1x16xf32>
    %12 = arith.mulf %7, %7 : vector<2x4x16xf32>
    %cst_12 = arith.constant dense<0.000000e+00> : vector<2x16xf32>
    %13 = vector.multi_reduction <add>, %12, %cst_12 [1] : vector<2x4x16xf32> to vector<2x16xf32>
    %14 = vector.shape_cast %13 : vector<2x16xf32> to vector<2x1x16xf32>
    %cst_13 = arith.constant 4.000000e+00 : f32
    %15 = vector.broadcast %cst_13 : f32 to vector<2x1x16xf32>
    %16 = arith.divf %14, %15 : vector<2x1x16xf32>
    %17 = arith.mulf %11, %11 : vector<2x1x16xf32>
    %18 = arith.subf %16, %17 : vector<2x1x16xf32>
    %cst_14 = arith.constant 9.99999974E-6 : f32
    %19 = vector.broadcast %cst_14 : f32 to vector<2x1x16xf32>
    %20 = arith.addf %18, %19 : vector<2x1x16xf32>
    %21 = math.rsqrt %20 : vector<2x1x16xf32>
    %22 = vector.shape_cast %5 : vector<1x16xf32> to vector<1x1x16xf32>
    %23 = vector.broadcast %22 : vector<1x1x16xf32> to vector<2x1x16xf32>
    %24 = arith.mulf %23, %21 : vector<2x1x16xf32>
    %25 = vector.broadcast %11 : vector<2x1x16xf32> to vector<2x4x16xf32>
    %26 = arith.subf %7, %25 : vector<2x4x16xf32>
    %27 = vector.broadcast %24 : vector<2x1x16xf32> to vector<2x4x16xf32>
    %28 = arith.mulf %26, %27 : vector<2x4x16xf32>
    %29 = vector.shape_cast %6 : vector<1x16xf32> to vector<1x1x16xf32>
    %30 = vector.broadcast %29 : vector<1x1x16xf32> to vector<2x4x16xf32>
    %31 = arith.addf %28, %30 : vector<2x4x16xf32>
    %c0_15 = arith.constant 0 : index
    %c0_16 = arith.constant 0 : index
    %32 = vector.load %arg5[%c0_15, %c0_16] : memref<1x16xf32, #tpu.memory_space<vmem>>, vector<1x16xf32>
    %c0_17 = arith.constant 0 : index
    %c0_18 = arith.constant 0 : index
    %33 = vector.load %arg7[%c0_17, %c0_18] : memref<1x16xf32, #tpu.memory_space<vmem>>, vector<1x16xf32>
    %34 = vector.shape_cast %4 : vector<8x16xf32> to vector<2x4x16xf32>
    %cst_19 = arith.constant dense<0.000000e+00> : vector<2x16xf32>
    %35 = vector.multi_reduction <add>, %34, %cst_19 [1] : vector<2x4x16xf32> to vector<2x16xf32>
    %36 = vector.shape_cast %35 : vector<2x16xf32> to vector<2x1x16xf32>
    %cst_20 = arith.constant 4.000000e+00 : f32
    %37 = vector.broadcast %cst_20 : f32 to vector<2x1x16xf32>
    %38 = arith.divf %36, %37 : vector<2x1x16xf32>
    %39 = arith.mulf %34, %34 : vector<2x4x16xf32>
    %cst_21 = arith.constant dense<0.000000e+00> : vector<2x16xf32>
    %40 = vector.multi_reduction <add>, %39, %cst_21 [1] : vector<2x4x16xf32> to vector<2x16xf32>
    %41 = vector.shape_cast %40 : vector<2x16xf32> to vector<2x1x16xf32>
    %cst_22 = arith.constant 4.000000e+00 : f32
    %42 = vector.broadcast %cst_22 : f32 to vector<2x1x16xf32>
    %43 = arith.divf %41, %42 : vector<2x1x16xf32>
    %44 = arith.mulf %38, %38 : vector<2x1x16xf32>
    %45 = arith.subf %43, %44 : vector<2x1x16xf32>
    %cst_23 = arith.constant 9.99999974E-6 : f32
    %46 = vector.broadcast %cst_23 : f32 to vector<2x1x16xf32>
    %47 = arith.addf %45, %46 : vector<2x1x16xf32>
    %48 = math.rsqrt %47 : vector<2x1x16xf32>
    %49 = vector.shape_cast %32 : vector<1x16xf32> to vector<1x1x16xf32>
    %50 = vector.broadcast %49 : vector<1x1x16xf32> to vector<2x1x16xf32>
    %51 = arith.mulf %50, %48 : vector<2x1x16xf32>
    %52 = vector.broadcast %38 : vector<2x1x16xf32> to vector<2x4x16xf32>
    %53 = arith.subf %34, %52 : vector<2x4x16xf32>
    %54 = vector.broadcast %51 : vector<2x1x16xf32> to vector<2x4x16xf32>
    %55 = arith.mulf %53, %54 : vector<2x4x16xf32>
    %56 = vector.shape_cast %33 : vector<1x16xf32> to vector<1x1x16xf32>
    %57 = vector.broadcast %56 : vector<1x1x16xf32> to vector<2x4x16xf32>
    %58 = arith.addf %55, %57 : vector<2x4x16xf32>
    %59 = arith.negf %58 : vector<2x4x16xf32>
    %60 = math.exp %59 : vector<2x4x16xf32>
    %cst_24 = arith.constant 1.000000e+00 : f32
    %61 = vector.broadcast %cst_24 : f32 to vector<2x4x16xf32>
    %62 = arith.addf %61, %60 : vector<2x4x16xf32>
    %63 = arith.divf %61, %62 : vector<2x4x16xf32>
    %64 = arith.mulf %31, %63 : vector<2x4x16xf32>
    %65 = vector.shape_cast %64 : vector<2x4x16xf32> to vector<8x16xf32>
    %c0_25 = arith.constant 0 : index
    %c0_26 = arith.constant 0 : index
    %66 = vector.load %arg8[%c0_25, %c0_26] : memref<8x16xf32, #tpu.memory_space<vmem>>, vector<8x16xf32>
    tpu.vector_store %arg8[%c0_25, %c0_26], %65 {strides = array<i32>} : memref<8x16xf32, #tpu.memory_space<vmem>>, vector<8x16xf32>,
    return
  }
  func.func @transform_0(%arg0: i32) -> (i32, i32) {
    %c0_i32 = arith.constant 0 : i32
    %c0_i32_0 = arith.constant 0 : i32
    return %arg0, %c0_i32 : i32, i32
  }
  func.func @transform_1(%arg0: i32) -> (i32, i32) {
    %c0_i32 = arith.constant 0 : i32
    %c0_i32_0 = arith.constant 0 : i32
    %c0_i32_1 = arith.constant 0 : i32
    return %c0_i32, %c0_i32_0 : i32, i32
  }
  func.func @transform_2(%arg0: i32) -> (i32, i32) {
    %c0_i32 = arith.constant 0 : i32
    %c0_i32_0 = arith.constant 0 : i32
    %c0_i32_1 = arith.constant 0 : i32
    return %c0_i32, %c0_i32_0 : i32, i32
  }
  func.func @transform_3(%arg0: i32) -> (i32, i32) {
    %c0_i32 = arith.constant 0 : i32
    %c0_i32_0 = arith.constant 0 : i32
    %c0_i32_1 = arith.constant 0 : i32
    return %c0_i32, %c0_i32_0 : i32, i32
  }
  func.func @transform_4(%arg0: i32) -> (i32, i32) {
    %c0_i32 = arith.constant 0 : i32
    %c0_i32_0 = arith.constant 0 : i32
    %c0_i32_1 = arith.constant 0 : i32
    return %c0_i32, %c0_i32_0 : i32, i32
  }
  func.func @transform_5(%arg0: i32) -> (i32, i32) {
    %c0_i32 = arith.constant 0 : i32
    %c0_i32_0 = arith.constant 0 : i32
    %c0_i32_1 = arith.constant 0 : i32
    return %c0_i32, %c0_i32_0 : i32, i32
  }
  func.func @transform_6(%arg0: i32) -> (i32, i32) {
    %c0_i32 = arith.constant 0 : i32
    %c0_i32_0 = arith.constant 0 : i32
    %c0_i32_1 = arith.constant 0 : i32
    return %c0_i32, %c0_i32_0 : i32, i32
  }
  func.func @transform_7(%arg0: i32) -> (i32, i32) {
    %c0_i32 = arith.constant 0 : i32
    %c0_i32_0 = arith.constant 0 : i32
    return %arg0, %c0_i32 : i32, i32
  }
}

</mosaic_0001>

<bundles_post_ra>
// kernel: tpu_custom_call.1
= control target key start
LH: loop header
LB: loop body
LE: loop exit
PB: predicated region body
PF: predicated region fallthrough
CT: control target
= control target key end

     0   :  { %v456_v3 = vmov 0.0|0.0   ;;  %vm457_vm0 = vmmov 0   ;;  %v458_v11 = vmov 0.0   ;;  %s587_s0 = inlined_call_operand.vmem [shape: f32[8,32], index: 0, kind: input, shape index: {}]   ;;  %s588_s1 = inlined_call_operand.vmem [shape: f32[32,16], index: 1, kind: input, shape index: {}]   ;;  %s589_s2 = inlined_call_operand.vmem [shape: f32[32,16], index: 2, kind: input, shape index: {}]   ;;  %s590_s3 = inlined_call_operand.vmem [shape: f32[1,16], index: 3, kind: input, shape index: {}]   ;;  %s591_s4 = inlined_call_operand.vmem [shape: f32[1,16], index: 4, kind: input, shape index: {}]   ;;  %s592_s5 = inlined_call_operand.vmem [shape: f32[1,16], index: 5, kind: input, shape index: {}]   ;;  %s593_s6 = inlined_call_operand.vmem [shape: f32[1,16], index: 6, kind: input, shape index: {}]   ;;  %s594_s7 = inlined_call_operand.hbm [shape: f32[8,16], index: 7, kind: output, shape index: {}]  }
   0x1   :  { %v28_v0 = vld [vmem:[%s588_s1] sm:$0xff]  ;;  %v29_v1 = vld [vmem:[%s588_s1 + $0x8] sm:$0xff]  ;;  %400 = vmatprep.subr.bf16.mxu0 %v456_v3  ;;  %406 = vmatprep.subr.bf16.mxu1 %v456_v3  ;;  %v30_v6 = vld [vmem:[%s588_s1 + $0x10] sm:$0xff] }
   0x2   :  { %v106_v2 = vld [vmem:[%s589_s2] sm:$0xff]  ;;  %v401_v4 = vpack.c.bf16 %v29_v1, %v28_v0  ;;  %v107_v5 = vld [vmem:[%s589_s2 + $0x8] sm:$0xff]  ;;  %v31_v7 = vld [vmem:[%s588_s1 + $0x18] sm:$0xff]  ;;  %386 = vmatprep.mubr.msk.f32.mxu0 %vm457_vm0, %v458_v11  ;;  %397 = vmatprep.mubr.msk.f32.mxu1 %vm457_vm0, %v458_v11 }
   0x3   :  { %v407_v8 = vpack.c.bf16 %v107_v5, %v106_v2  ;;  %v108_v9 = vld [vmem:[%s589_s2 + $0x10] sm:$0xff]  ;;  %v109_v10 = vld [vmem:[%s589_s2 + $0x18] sm:$0xff]  ;;  %v404_v12 = vpack.c.bf16 %v31_v7, %v30_v6 }
   0x4   :  { %402 = vmatpush3.bf16.msra.mxu0 %v401_v4 }
   0x5   :  { %12 = vsyncpa [#allocation3], 0  ;;  %408 = vmatpush3.bf16.msra.mxu1 %v407_v8  ;;  %403 = vmatprep.subr.bf16.mxu0 %v456_v3  ;;  %v410_v13 = vpack.c.bf16 %v109_v10, %v108_v9  ;;  %v27_v14 = vld [vmem:[%s587_s0] sm:$0xff]  ;;  %vm32_vm1 = vcmask 261120   ;;  %vm185_vm2 = vcmask 125952   ;;  %vm346_vm3 = vcmask 130048  }
   0x6   :  { %409 = vmatprep.subr.bf16.mxu1 %v456_v3 }
   0x8   :  { %405 = vmatpush3.bf16.msra.mxu0 %v404_v12 }
   0x9   :  { %411 = vmatpush3.bf16.msra.mxu1 %v410_v13 }
   0xb   :  { %387 = vmatmul.mubr.msk.f32.vlgmr.msra.gmra.mrb[0].mxu0 %vm32_vm1, %v27_v14 }
   0xc   :  { %398 = vmatmul.mubr.msk.f32.vlgmr.msra.gmra.mrb[0].mxu1 %vm32_vm1, %v27_v14 }
  0xde   :  { %v527_v15 = vpop.f32.mrb[0].mxu0 }
  0xdf   :  { %v531_v16 = vcombine.high %v527_v15, %v527_v15  ;;  %v186_v17 = vsel %vm185_vm2, %v527_v15, 0.0  ;;  %v203_v18 = vmul.f32 %v527_v15, %v527_v15  ;;  %v537_v19 = vpop.f32.mrb[0].mxu1  ;;  %v388_v20 = vpop.f32.mrb[1].mxu0 }
  0xe0   :  { %v541_v21 = vcombine.high %v537_v19, %v537_v19  ;;  %v260_v22 = vsel %vm185_vm2, %v537_v19, 0.0  ;;  %v399_v23 = vpop.f32.mrb[1].mxu1  ;;  %v276_v27 = vmul.f32 %v537_v19, %v537_v19  ;;  %v187_v28 = vrot.slane %v186_v17, 4 }
  0xe1   :  { %v193_v24 = vsel %vm185_vm2, %v531_v16, 0.0  ;;  %v204_v25 = vmul.f32 %v531_v16, %v531_v16  ;;  %v261_v26 = vrot.slane %v260_v22, 4  ;;  %v205_v30 = vsel %vm185_vm2, %v203_v18, 0.0 }
  0xe2   :  { %v267_v29 = vsel %vm185_vm2, %v541_v21, 0.0  ;;  %v277_v33 = vmul.f32 %v541_v21, %v541_v21  ;;  %v194_v34 = vrot.slane %v193_v24, 4  ;;  %v278_v38 = vsel %vm185_vm2, %v276_v27, 0.0 }
  0xe3   :  { %v262_v31 = vadd.f32 %v261_v26, %v260_v22  ;;  %v268_v32 = vrot.slane %v267_v29, 4  ;;  %v212_v35 = vsel %vm185_vm2, %v204_v25, 0.0  ;;  %v188_v40 = vadd.f32 %v187_v28, %v186_v17 }
  0xe4   :  { %v285_v39 = vsel %vm185_vm2, %v277_v33, 0.0  ;;  %v206_v41 = vrot.slane %v205_v30, 4  ;;  %v279_v44 = vrot.slane %v278_v38, 4  ;;  %v195_v46 = vadd.f32 %v194_v34, %v193_v24 }
  0xe5   :  { %v263_v36 = vrot.slane %v262_v31, 2  ;;  %v269_v37 = vadd.f32 %v268_v32, %v267_v29  ;;  %v286_v45 = vrot.slane %v285_v39, 4  ;;  %v213_v47 = vrot.slane %v212_v35, 4 }
  0xe6   :  { %v280_v50 = vadd.f32 %v279_v44, %v278_v38  ;;  %v189_v52 = vrot.slane %v188_v40, 2  ;;  %v207_v53 = vadd.f32 %v206_v41, %v205_v30  ;;  %v196_v58 = vrot.slane %v195_v46, 2 }
  0xe7   :  { %v264_v42 = vadd.f32 %v263_v36, %v262_v31  ;;  %v270_v43 = vrot.slane %v269_v37, 2  ;;  %v287_v51 = vadd.f32 %v286_v45, %v285_v39  ;;  %v214_v59 = vadd.f32 %v213_v47, %v212_v35  ;;  %v255_v39 = vld [vmem:[%s591_s4] sm:$0x1] }
  0xe8   :  { %v281_v56 = vrot.slane %v280_v50, 2  ;;  %v190_v0 = vadd.f32 %v189_v52, %v188_v40  ;;  %v208_v1 = vrot.slane %v207_v53, 2  ;;  %v197_v5 = vadd.f32 %v196_v58, %v195_v46 }
  0xe9   :  { %v265_v48 = vrot.slane %v264_v42, 1  ;;  %v271_v49 = vadd.f32 %v270_v43, %v269_v37  ;;  %v288_v57 = vrot.slane %v287_v51, 2  ;;  %v215_v6 = vrot.slane %v214_v59, 2 }
  0xea   :  { %v282_v62 = vadd.f32 %v281_v56, %v280_v50  ;;  %v191_v11 = vrot.slane %v190_v0, 1  ;;  %v209_v12 = vadd.f32 %v208_v1, %v207_v53  ;;  %v198_v17 = vrot.slane %v197_v5, 1  ;;  %v365_v50 = vld [vmem:[%s593_s6] ss:$0 sm:$0xff] }
  0xeb   :  { %v266_v54 = vadd.f32 %v265_v48, %v264_v42  ;;  %v272_v55 = vrot.slane %v271_v49, 1  ;;  %v289_v63 = vadd.f32 %v288_v57, %v287_v51  ;;  %v216_v18 = vadd.f32 %v215_v6, %v214_v59 }
  0xec   :  { %v283_v3 = vrot.slane %v282_v62, 1  ;;  %v192_v23 = vadd.f32 %v191_v11, %v190_v0  ;;  %v210_v24 = vrot.slane %v209_v12, 1  ;;  %v199_v27 = vadd.f32 %v198_v17, %v197_v5 }
  0xed   :  { %v273_v60 = vadd.f32 %v272_v55, %v271_v49  ;;  %v274_v61 = vmul.f32 0.25, %v266_v54  ;;  %v290_v4 = vrot.slane %v289_v63, 1  ;;  %v217_v28 = vrot.slane %v216_v18, 1 }
  0xee   :  { %v284_v7 = vadd.f32 %v283_v3, %v282_v62  ;;  %v235_v29 = vlaneseq  ;;  %v201_v30 = vmul.f32 0.25, %v192_v23  ;;  %v211_v31 = vadd.f32 %v210_v24, %v209_v12 }
  0xef   :  { %v275_v2 = vmul.f32 0.25, %v273_v60  ;;  %v291_v8 = vadd.f32 %v290_v4, %v289_v63  ;;  %v294_v9 = vmul.f32 %v274_v61, %v274_v61  ;;  %v202_v32 = vmul.f32 0.25, %v199_v27  ;;  %v180_v60 = vld [vmem:[%s590_s3] sm:$0x1]  ;;  %s459_s3 = smov [#allocation2]  }
  0xf0   :  { %v292_v13 = vmul.f32 0.25, %v284_v7  ;;  %v218_v33 = vadd.f32 %v217_v28, %v216_v18  ;;  %v236_v34 = vshrl.u32 %v235_v29, 7  ;;  %v219_v35 = vmul.f32 0.25, %v211_v31  ;;  %s354_s22 = sshll.u32 %s459_s3, 4  ;;  %s355_s22 = int_to_ptr.vmem [resolvable:$true] %s354_s22 }
  0xf1   :  { %v295_v10 = vmul.f32 %v275_v2, %v275_v2  ;;  %v293_v14 = vmul.f32 0.25, %v291_v8  ;;  %v221_v36 = vmul.f32 %v201_v30, %v201_v30  ;;  %v222_v38 = vmul.f32 %v202_v32, %v202_v32  ;;  %v364_v8 = vld [vmem:[%s592_s5] ss:$0 sm:$0xff]  ;;  %s432_s23 = scalar_lea.vmem %s355_s22, 128  ;;  %p437_p1 = scmp.lt.s32.totalorder %s355_s22, %s355_s22 }
  0xf2   :  { %v296_v20 = vsub.f32 %v292_v13, %v294_v9  ;;  %v220_v37 = vmul.f32 0.25, %v218_v33  ;;  %v237_v40 = vsub.s32 0, %v236_v34  ;;  %v304_v47 = vsub.f32 %v537_v19, %v274_v61  ;;  %p433_p0 = scmp.ne.s32.totalorder %s355_s22, %s432_s23  ;;  %p438_p2 = scmp.lt.s32.totalorder %s432_s23, %s432_s23 }
  0xf3   :  { %v297_v22 = vsub.f32 %v293_v14, %v295_v10  ;;  %v223_v42 = vsub.f32 %v219_v35, %v221_v36  ;;  %v305_v51 = vsub.f32 %v541_v21, %v275_v2  ;;  %v231_v5 = vsub.f32 %v527_v15, %v201_v30 }
  0xf4   :  { %v298_v25 = vadd.f32 1e-05, %v296_v20  ;;  %v224_v44 = vsub.f32 %v220_v37, %v222_v38  ;;  %v232_v6 = vsub.f32 %v531_v16, %v202_v32  ;;  %p439_p3 = por %p438_p2, %p437_p1 }
  0xf5   :  { %v299_v26 = vadd.f32 1e-05, %v297_v22  ;;  %v225_v49 = vadd.f32 1e-05, %v223_v42 }
  0xf6   :  { %416 = vrsqrt.f32 %v298_v25  ;;  %v226_v53 = vadd.f32 1e-05, %v224_v44  ;;  %p440_p4 = pnand %p439_p3, %p433_p0 }
  0xf7   :  { %418 = vrsqrt.f32 %v299_v26 }
  0xf8   :  { %420 = vrsqrt.f32 %v225_v49 }
  0xf9   :  { %422 = vrsqrt.f32 %v226_v53 }
 0x100   :  { %v417_v41 = vpop.eup %416 }
 0x101   :  { %v419_v43 = vpop.eup %418  ;;  %v302_v45 = vmul.f32 %v417_v41, %v255_v39 }
 0x102   :  { %v303_v46 = vmul.f32 %v419_v43, %v255_v39  ;;  %v421_v19 = vpop.eup %420 }
 0x103   :  { %v311_v48 = vrot.slane %v302_v45, %v237_v40  ;;  %v423_v61 = vpop.eup %422  ;;  %v229_v21 = vmul.f32 %v421_v19, %v180_v60 }
 0x104   :  { %v315_v52 = vrot.slane %v303_v46, %v237_v40  ;;  %v230_v1 = vmul.f32 %v423_v61, %v180_v60 }
 0x105   :  { %v318_v54 = vmul.f32 %v311_v48, %v304_v47  ;;  %v238_v3 = vrot.slane %v229_v21, %v237_v40 }
 0x106   :  { %v319_v55 = vmul.f32 %v315_v52, %v305_v51  ;;  %v242_v4 = vrot.slane %v230_v1, %v237_v40 }
 0x107   :  { %v326_v56 = vadd.f32 %v365_v50, %v318_v54  ;;  %v245_v7 = vmul.f32 %v238_v3, %v231_v5 }
 0x108   :  { %v327_v57 = vadd.f32 %v365_v50, %v319_v55  ;;  %v246_v9 = vmul.f32 %v242_v4, %v232_v6 }
 0x109   :  { %v366_v58 = vmul.f32 -1.442695, %v326_v56  ;;  %v253_v10 = vadd.f32 %v364_v8, %v245_v7 }
 0x10a   :  { %v367_v59 = vmul.f32 -1.442695, %v327_v57  ;;  %v254_v12 = vadd.f32 %v364_v8, %v246_v9 }
 0x10b   :  { %424 = vpow2.f32 %v366_v58 }
 0x10c   :  { %426 = vpow2.f32 %v367_v59 }
 0x115   :  { %v425_v62 = vpop.eup %424 }
 0x116   :  { %v427_v63 = vpop.eup %426  ;;  %v334_v0 = vadd.f32 1.0, %v425_v62 }
 0x117   :  { %v335_v2 = vadd.f32 1.0, %v427_v63 }
 0x118   :  { %428 = vrcp.f32 %v334_v0 }
 0x119   :  { %430 = vrcp.f32 %v335_v2 }
 0x122   :  { %v429_v11 = vpop.eup %428 }
 0x123   :  { %v431_v13 = vpop.eup %430  ;;  %v340_v14 = vmul.f32 %v429_v11, %v253_v10 }
 0x124   :  { %v341_v17 = vmul.f32 %v431_v13, %v254_v12 }
 0x126   :  { %v344_v18 = vcombine.low %v340_v14, %v341_v17 }
 0x128   :  { %347 = vst.msk [vmem:[#allocation2] sm:$0xff] %vm346_vm3, %v344_v18 }
 0x129   :  { %443 = shalt.err (!%p440_p4)
}
 0x12a   :  { %s444_s25 = scalar_lea.hbm %s594_s7, 128 }
 0x12b   :  { %p445_p5 = scmp.ne.s32.totalorder %s594_s7, %s444_s25  ;;  %p448_p6 = scmp.lt.u32.totalorder %s444_s25, %s594_s7 }
 0x12d   :  { %p450_p7 = pnand %p448_p6, %p445_p5 }
 0x12f   :  { %453 = shalt.err (!%p450_p7)
}
 0x130   :  { %357 = dma.vmem_to_hbm [thread:$0]  %s355_s22, 128, %s594_s7, [#allocation3]  }
 0x131   :  { %454 = dma.done.wait [#allocation3], 128  }
 0x132   :  { %455 = vsyncadd [#allocation3], 4294967168 }
 0x133   :  { %361 = vsyncpa [#allocation3], 1 }

</bundles_post_ra>
